<compile_context>
chip_gen: v5e
topology: v5e:2x2
jax: 0.10.0
libtpu: 0.0.40
codegen_flags: <defaults>
</compile_context>

<pallas_src>
import math
from functools import partial

import jax
import jax.numpy as jnp
from jax import lax
from jax.experimental import pallas as pl
from jax.experimental.pallas import tpu as pltpu

_MASK_VALUE = -1e30  # finite large-negative; exp(mask - max) underflows to 0


def _causal_attn_kernel(x_ref, w_ref, o_ref, *, block_b, seq_len, d_pad,
                        compute_dtype):
    t = seq_len
    dp = d_pad

    # Fused QKV projection: one MXU pass over all block_b*t rows.
    # x_ref: (block_b*t, d_in) bf16, w_ref: (d_in, 3*dp) bf16 (Wq pre-scaled).
    qkv = jnp.dot(x_ref[...], w_ref[...],
                  preferred_element_type=jnp.float32)          # (block_b*t, 3*dp) f32

    # Lane-aligned static slices (dp is a multiple of 128).
    q = qkv[:, :dp].astype(compute_dtype)                       # scale already folded in
    k = qkv[:, dp:2 * dp].astype(compute_dtype)
    v = qkv[:, 2 * dp:].astype(compute_dtype)

    # Causal mask bias, computed once and reused for every sequence in the block.
    row = lax.broadcasted_iota(jnp.int32, (t, t), 0)
    col = lax.broadcasted_iota(jnp.int32, (t, t), 1)
    neg = jnp.where(col > row, jnp.float32(_MASK_VALUE), jnp.float32(0.0))

    # TODO(synk): dropout is identity here (p=0 / eval-mode semantics); a
    # train-mode stochastic mask would need pltpu.prng_* and cannot match
    # torch's RNG stream.

    ctx = []
    for j in range(block_b):                                    # static unroll
        lo = j * t                                              # sublane-aligned (t % 8 == 0 here)
        qj = q[lo:lo + t]
        kj = k[lo:lo + t]
        vj = v[lo:lo + t]

        # scores = qj @ kj^T without materializing a transpose of kj.
        s = lax.dot_general(qj, kj, (((1,), (1,)), ((), ())),
                            preferred_element_type=jnp.float32) + neg  # (t, t) f32

        m = jnp.max(s, axis=-1, keepdims=True)
        e = jnp.exp(s - m)
        inv = pl.reciprocal(jnp.sum(e, axis=-1, keepdims=True), approx=True)

        pv = jnp.dot(e.astype(compute_dtype), vj,
                     preferred_element_type=jnp.float32)        # (t, dp) f32
        ctx.append(pv * inv)                                    # normalize after PV

    # Single lane-dense store of the whole block.
    o_ref[...] = jnp.concatenate(ctx, axis=0).astype(o_ref.dtype)


def causal_attention(x, wq, wk, wv, *, block_b=None,
                     compute_dtype=jnp.bfloat16):
    """x: (B, T, d_in); wq/wk/wv: (d_out, d_in) PyTorch nn.Linear layout (no bias)."""
    b, t, d_in = x.shape
    d_out = wq.shape[0]

    # Pad the head dim to a multiple of 128 lanes for dense stores / aligned slices.
    dp = 128 * pl.cdiv(d_out, 128)
    scale = 1.0 / math.sqrt(d_out)  # matches keys.shape[-1] ** 0.5 (true d_out)

    def prep(w):  # (d_out, d_in) torch layout -> (d_in, dp) zero-padded
        wt = w.T.astype(jnp.float32)
        return jnp.pad(wt, ((0, 0), (0, dp - d_out)))

    # Fused weight; fold the softmax scale into Wq (weight prep, done once).
    w_qkv = jnp.concatenate([prep(wq) * scale, prep(wk), prep(wv)],
                            axis=1).astype(compute_dtype)       # (d_in, 3*dp)

    # Batch several sequences per grid step so the projection M dim is filled.
    if block_b is None:
        block_b = max(1, min(b, -(-256 // t)))
    while b % block_b:
        block_b -= 1
    if (block_b * t) % 8 != 0 and block_b != b:
        block_b = b  # keep block second-to-last dim tile-friendly

    rows = block_b * t
    x2 = x.reshape(b * t, d_in).astype(compute_dtype)

    out2 = pl.pallas_call(
        partial(_causal_attn_kernel, block_b=block_b, seq_len=t, d_pad=dp,
                compute_dtype=compute_dtype),
        out_shape=jax.ShapeDtypeStruct((b * t, dp), x.dtype),
        grid_spec=pltpu.PrefetchScalarGridSpec(
            num_scalar_prefetch=0,
            grid=(b // block_b,),
            in_specs=[
                pl.BlockSpec((rows, d_in), lambda i: (i, 0)),
                pl.BlockSpec((d_in, 3 * dp), lambda i: (0, 0)),
            ],
            out_specs=pl.BlockSpec((rows, dp), lambda i: (i, 0)),
        ),
        compiler_params=pltpu.CompilerParams(
            dimension_semantics=("parallel",),
            vmem_limit_bytes=48 * 1024 * 1024,
        ),
    )(x2, w_qkv)

    out = out2.reshape(b, t, dp)
    if dp != d_out:
        out = out[..., :d_out]
    return out


def causal_attention_ref(x, wq, wk, wv):
    """Pure-JAX f32 reference mirroring the PyTorch forward (dropout identity)."""
    q = x @ wq.T
    k = x @ wk.T
    v = x @ wv.T
    scores = jnp.einsum("btd,bsd->bts", q, k)
    t = x.shape[1]
    mask = jnp.triu(jnp.ones((t, t), dtype=bool), k=1)
    scores = jnp.where(mask[None, :, :], -jnp.inf, scores)
    w = jax.nn.softmax(scores / math.sqrt(k.shape[-1]), axis=-1)
    return w @ v


if __name__ == "__main__":
    # Module config: d_in=32, d_out=32, context_length=8, dropout=0.0, no bias.
    B, T, D_IN, D_OUT = 2, 8, 32, 32

    key = jax.random.PRNGKey(0)
    kx, kq, kk, kv = jax.random.split(key, 4)

    x = jax.random.normal(kx, (B, T, D_IN), dtype=jnp.float32)
    bound = 1.0 / math.sqrt(D_IN)
    wq = jax.random.uniform(kq, (D_OUT, D_IN), jnp.float32, -bound, bound)
    wk = jax.random.uniform(kk, (D_OUT, D_IN), jnp.float32, -bound, bound)
    wv = jax.random.uniform(kv, (D_OUT, D_IN), jnp.float32, -bound, bound)

    out = causal_attention(x, wq, wk, wv)
    out = jax.block_until_ready(out)

    ref = causal_attention_ref(x, wq, wk, wv)
    assert out.shape == (B, T, D_OUT)
    # bf16 matmul inputs with f32 accumulation -> compare with a loose tolerance.
    assert jnp.allclose(out, ref, atol=5e-2, rtol=5e-2), "mismatch vs reference"

    print("KERNEL_OK")
</pallas_src>

<mosaic_0001>
module attributes {stable_mosaic.version = 11 : i64} {
  func.func @_causal_attn_kernel(%arg0: i32, %arg1: memref<16x32xbf16, #tpu.memory_space<vmem>>, %arg2: memref<32x384xbf16, #tpu.memory_space<vmem>>, %arg3: memref<16x128xf32, #tpu.memory_space<vmem>>) attributes {dimension_semantics = [#tpu.dimension_semantics<parallel>], iteration_bounds = array<i64: 1>, scalar_prefetch = 0 : i64, scratch_operands = 0 : i64, tpu.core_type = #tpu.core_type<tc>, window_params = [{transform_indices = @transform_0, window_bounds = array<i64: 16, 32>}, {pipeline_mode = #tpu.pipeline_mode<synchronous>, transform_indices = @transform_1, window_bounds = array<i64: 32, 384>}, {transform_indices = @transform_2, window_bounds = array<i64: 16, 128>}]} {
    %c0 = arith.constant 0 : index
    %c0_0 = arith.constant 0 : index
    %0 = vector.load %arg1[%c0, %c0_0] : memref<16x32xbf16, #tpu.memory_space<vmem>>, vector<16x32xbf16>
    %c0_1 = arith.constant 0 : index
    %c0_2 = arith.constant 0 : index
    %1 = vector.load %arg2[%c0_1, %c0_2] : memref<32x384xbf16, #tpu.memory_space<vmem>>, vector<32x384xbf16>
    %cst = arith.constant dense<0.000000e+00> : vector<16x384xf32>
    %2 = tpu.matmul %0, %1, %cst {dimension_numbers = #tpu.dot_dimension_numbers<[1], [0], [0], [1], [0, 0, 1, 1], [], []>} : vector<16x32xbf16>, vector<32x384xbf16>, vector<16x384xf32> -> vector<16x384xf32>
    %3 = vector.extract_strided_slice %2 {offsets = [0, 0], sizes = [16, 128], strides = [1, 1]} : vector<16x384xf32> to vector<16x128xf32>
    %4 = arith.truncf %3 : vector<16x128xf32> to vector<16x128xbf16>
    %5 = vector.extract_strided_slice %2 {offsets = [0, 128], sizes = [16, 128], strides = [1, 1]} : vector<16x384xf32> to vector<16x128xf32>
    %6 = arith.truncf %5 : vector<16x128xf32> to vector<16x128xbf16>
    %7 = vector.extract_strided_slice %2 {offsets = [0, 256], sizes = [16, 128], strides = [1, 1]} : vector<16x384xf32> to vector<16x128xf32>
    %8 = arith.truncf %7 : vector<16x128xf32> to vector<16x128xbf16>
    %9 = tpu.iota {dimensions = array<i32: 0>} : vector<8x8xi32>
    %10 = tpu.iota {dimensions = array<i32: 1>} : vector<8x8xi32>
    %11 = arith.cmpi sgt, %10, %9 : vector<8x8xi32>
    %cst_3 = arith.constant -1.000000e+30 : f32
    %cst_4 = arith.constant 0.000000e+00 : f32
    %12 = vector.broadcast %cst_3 : f32 to vector<8x8xf32>
    %13 = vector.broadcast %cst_4 : f32 to vector<8x8xf32>
    %14 = arith.select %11, %12, %13 : vector<8x8xi1>, vector<8x8xf32>
    %15 = vector.extract_strided_slice %4 {offsets = [0, 0], sizes = [8, 128], strides = [1, 1]} : vector<16x128xbf16> to vector<8x128xbf16>
    %16 = vector.extract_strided_slice %6 {offsets = [0, 0], sizes = [8, 128], strides = [1, 1]} : vector<16x128xbf16> to vector<8x128xbf16>
    %17 = vector.extract_strided_slice %8 {offsets = [0, 0], sizes = [8, 128], strides = [1, 1]} : vector<16x128xbf16> to vector<8x128xbf16>
    %cst_5 = arith.constant dense<0.000000e+00> : vector<8x8xf32>
    %18 = tpu.matmul %15, %16, %cst_5 {dimension_numbers = #tpu.dot_dimension_numbers<[1], [1], [0], [0], [0, 0, 1, 0], [], []>} : vector<8x128xbf16>, vector<8x128xbf16>, vector<8x8xf32> -> vector<8x8xf32>
    %19 = arith.addf %18, %14 : vector<8x8xf32>
    %cst_6 = arith.constant dense<0xFF800000> : vector<8xf32>
    %20 = vector.multi_reduction <maximumf>, %19, %cst_6 [1] : vector<8x8xf32> to vector<8xf32>
    %21 = vector.shape_cast %20 : vector<8xf32> to vector<8x1xf32>
    %22 = vector.broadcast %21 : vector<8x1xf32> to vector<8x8xf32>
    %23 = arith.subf %19, %22 : vector<8x8xf32>
    %24 = math.exp %23 : vector<8x8xf32>
    %cst_7 = arith.constant dense<0.000000e+00> : vector<8xf32>
    %25 = vector.multi_reduction <add>, %24, %cst_7 [1] : vector<8x8xf32> to vector<8xf32>
    %26 = vector.shape_cast %25 : vector<8xf32> to vector<8x1xf32>
    %27 = tpu.reciprocal %26 {approx = true} : vector<8x1xf32> -> vector<8x1xf32>
    %28 = arith.truncf %24 : vector<8x8xf32> to vector<8x8xbf16>
    %cst_8 = arith.constant dense<0.000000e+00> : vector<8x128xf32>
    %29 = tpu.matmul %28, %17, %cst_8 {dimension_numbers = #tpu.dot_dimension_numbers<[1], [0], [0], [1], [0, 0, 1, 1], [], []>} : vector<8x8xbf16>, vector<8x128xbf16>, vector<8x128xf32> -> vector<8x128xf32>
    %30 = vector.broadcast %27 : vector<8x1xf32> to vector<8x128xf32>
    %31 = arith.mulf %29, %30 : vector<8x128xf32>
    %32 = vector.extract_strided_slice %4 {offsets = [8, 0], sizes = [8, 128], strides = [1, 1]} : vector<16x128xbf16> to vector<8x128xbf16>
    %33 = vector.extract_strided_slice %6 {offsets = [8, 0], sizes = [8, 128], strides = [1, 1]} : vector<16x128xbf16> to vector<8x128xbf16>
    %34 = vector.extract_strided_slice %8 {offsets = [8, 0], sizes = [8, 128], strides = [1, 1]} : vector<16x128xbf16> to vector<8x128xbf16>
    %cst_9 = arith.constant dense<0.000000e+00> : vector<8x8xf32>
    %35 = tpu.matmul %32, %33, %cst_9 {dimension_numbers = #tpu.dot_dimension_numbers<[1], [1], [0], [0], [0, 0, 1, 0], [], []>} : vector<8x128xbf16>, vector<8x128xbf16>, vector<8x8xf32> -> vector<8x8xf32>
    %36 = arith.addf %35, %14 : vector<8x8xf32>
    %cst_10 = arith.constant dense<0xFF800000> : vector<8xf32>
    %37 = vector.multi_reduction <maximumf>, %36, %cst_10 [1] : vector<8x8xf32> to vector<8xf32>
    %38 = vector.shape_cast %37 : vector<8xf32> to vector<8x1xf32>
    %39 = vector.broadcast %38 : vector<8x1xf32> to vector<8x8xf32>
    %40 = arith.subf %36, %39 : vector<8x8xf32>
    %41 = math.exp %40 : vector<8x8xf32>
    %cst_11 = arith.constant dense<0.000000e+00> : vector<8xf32>
    %42 = vector.multi_reduction <add>, %41, %cst_11 [1] : vector<8x8xf32> to vector<8xf32>
    %43 = vector.shape_cast %42 : vector<8xf32> to vector<8x1xf32>
    %44 = tpu.reciprocal %43 {approx = true} : vector<8x1xf32> -> vector<8x1xf32>
    %45 = arith.truncf %41 : vector<8x8xf32> to vector<8x8xbf16>
    %cst_12 = arith.constant dense<0.000000e+00> : vector<8x128xf32>
    %46 = tpu.matmul %45, %34, %cst_12 {dimension_numbers = #tpu.dot_dimension_numbers<[1], [0], [0], [1], [0, 0, 1, 1], [], []>} : vector<8x8xbf16>, vector<8x128xbf16>, vector<8x128xf32> -> vector<8x128xf32>
    %47 = vector.broadcast %44 : vector<8x1xf32> to vector<8x128xf32>
    %48 = arith.mulf %46, %47 : vector<8x128xf32>
    %49 = tpu.concatenate %31, %48 in 0 : vector<8x128xf32>, vector<8x128xf32> -> vector<16x128xf32>
    %c0_13 = arith.constant 0 : index
    %c0_14 = arith.constant 0 : index
    %50 = vector.load %arg3[%c0_13, %c0_14] : memref<16x128xf32, #tpu.memory_space<vmem>>, vector<16x128xf32>
    tpu.vector_store %arg3[%c0_13, %c0_14], %49 {strides = array<i32>} : memref<16x128xf32, #tpu.memory_space<vmem>>, vector<16x128xf32>,
    return
  }
  func.func @transform_0(%arg0: i32) -> (i32, i32) {
    %c0_i32 = arith.constant 0 : i32
    %c0_i32_0 = arith.constant 0 : i32
    return %arg0, %c0_i32 : i32, i32
  }
  func.func @transform_1(%arg0: i32) -> (i32, i32) {
    %c0_i32 = arith.constant 0 : i32
    %c0_i32_0 = arith.constant 0 : i32
    %c0_i32_1 = arith.constant 0 : i32
    return %c0_i32, %c0_i32_0 : i32, i32
  }
  func.func @transform_2(%arg0: i32) -> (i32, i32) {
    %c0_i32 = arith.constant 0 : i32
    %c0_i32_0 = arith.constant 0 : i32
    return %arg0, %c0_i32 : i32, i32
  }
}

</mosaic_0001>

<bundles_post_ra>
// kernel: tpu_custom_call.1
= control target key start
LH: loop header
LB: loop body
LE: loop exit
PB: predicated region body
PF: predicated region fallthrough
CT: control target
= control target key end

     0   :  { %7 = vsyncpa [#allocation3], 0  ;;  %s438_s0 = inlined_call_operand.hbm [shape: bf16[16,32], index: 0, kind: input, shape index: {}]   ;;  %s439_s1 = inlined_call_operand.hbm [shape: bf16[32,384], index: 1, kind: input, shape index: {}]   ;;  %s440_s2 = inlined_call_operand.hbm [shape: f32[16,128], index: 2, kind: output, shape index: {}]  }
   0x1   :  { %8 = vsyncpa [#allocation6], 0 }
   0x2   :  { %9 = vsyncpa [#allocation4], 0  ;;  %s14_s11 = sshll.u32 %s438_s0, 4  ;;  %s398_s12 = smov [#allocation2]   ;;  %s15_s11 = int_to_ptr.hbm [resolvable:$true] %s14_s11 }
   0x3   :  { %s16_s13 = sshll.u32 %s398_s12, 4  ;;  %s27_s16 = sshll.u32 %s439_s1, 4  ;;  %s17_s13 = int_to_ptr.vmem [resolvable:$true] %s16_s13  ;;  %s28_s16 = int_to_ptr.hbm [resolvable:$true] %s27_s16 }
   0x4   :  { %s399_s17 = smov 64   ;;  %s400_s18 = smov 4  }
   0x5   :  { %22 = dma.hbm_to_vmem [thread:$0]  %s15_s11, 128, %s17_s13, [#allocation3], %s399_s17, %s399_s17, %s400_s18  }
   0x6   :  { %s401_s19 = smov [#allocation5]   ;;  %s402_s21 = smov 192  }
   0x7   :  { %s29_s20 = sshll.u32 %s401_s19, 4  ;;  %s403_s22 = smov 12   ;;  %s30_s20 = int_to_ptr.vmem [resolvable:$true] %s29_s20 }
   0x8   :  { %35 = dma.hbm_to_vmem [thread:$0]  %s28_s16, 768, %s30_s20, [#allocation6], %s402_s21, %s402_s21, %s403_s22  }
   0x9   :  { %392 = dma.done.wait [#allocation3], 128  }
   0xa   :  { %393 = vsyncadd [#allocation3], 4294967168 }
   0xb   :  { %394 = dma.done.wait [#allocation6], 768  }
   0xc   :  { %395 = vsyncadd [#allocation6], 4294966528  ;;  %v299_v0 = vld [vmem:[#allocation5 + $0x1c] sm:$0xf]  ;;  %v282_v1 = vld [vmem:[#allocation5 + $0x24] sm:$0xf0]  ;;  %v144_v27 = vlaneseq }
   0xd   :  { %v296_v2 = vld [vmem:[#allocation5 + $0x4] sm:$0xf]  ;;  %v285_v3 = vor.u32 %v299_v0, %v282_v1  ;;  %v270_v4 = vld [vmem:[#allocation5 + $0xc] sm:$0xf0]  ;;  %v280_v5 = vld [vmem:[#allocation5 + $0x18] sm:$0xf] }
   0xe   :  { %v300_v6 = vld [vmem:[#allocation5 + $0x20] sm:$0xf0]  ;;  %v268_v8 = vld [vmem:[#allocation5] sm:$0xf]  ;;  %v297_v9 = vld [vmem:[#allocation5 + $0x8] sm:$0xf0]  ;;  %v273_v10 = vor.u32 %v296_v2, %v270_v4 }
   0xf   :  { %v281_v7 = vor.u32 %v300_v6, %v280_v5  ;;  %116 = vmatpush.bf16.msra.mxu1 %v285_v3  ;;  %v269_v11 = vor.u32 %v297_v9, %v268_v8  ;;  %v295_v12 = vld [vmem:[#allocation2] sm:$0xff]  ;;  %vm92_vm0 = vcmask 261120   ;;  %v288_v13 = vld [vmem:[#allocation5 + $0x20] sm:$0xf]  ;;  %v301_v14 = vld [vmem:[#allocation5 + $0x28] sm:$0xf0] }
  0x10   :  { %v276_v15 = vld [vmem:[#allocation5 + $0x8] sm:$0xf]  ;;  %v289_v16 = vor.u32 %v301_v14, %v288_v13  ;;  %v298_v17 = vld [vmem:[#allocation5 + $0x10] sm:$0xf0]  ;;  %v145_v28 = vshrl.u32 %v144_v27, 7  ;;  %v147_v29 = vand.u32 127, %v144_v27 }
  0x11   :  { %102 = vmatpush.bf16.msra.mxu0 %v281_v7  ;;  %v277_v18 = vor.u32 %v298_v17, %v276_v15  ;;  %v404_v31 = vmov 0.0   ;;  %vm163_vm2 = vcmask 64512   ;;  %vm178_vm3 = vcmask 1043456   ;;  %s405_s0 = smov [#allocation7]   ;;  %s248_s25 = sshll.u32 %s440_s2, 4  ;;  %s249_s25 = int_to_ptr.hbm [resolvable:$true] %s248_s25 }
  0x12   :  { %130 = vmatpush.bf16.msra.mxu2 %v289_v16  ;;  %vm148_vm1 = vcmp.gt.s32.totalorder %v147_v29, %v145_v28  ;;  %s246_s1 = sshll.u32 %s405_s0, 4  ;;  %s406_s26 = smov 128   ;;  %s247_s1 = int_to_ptr.vmem [resolvable:$true] %s246_s1 }
  0x13   :  { %117 = vmatpush.bf16.msra.mxu1 %v273_v10  ;;  %v149_v32 = vsel %vm148_vm1, -1e+30, %v404_v31  ;;  %s407_s27 = smov 8  }
  0x15   :  { %103 = vmatpush.bf16.msra.mxu0 %v269_v11 }
  0x16   :  { %291 = vmatmul.msk.bf16.vlgmr.msra.gmra.mxu1 %vm92_vm0, %v295_v12  ;;  %131 = vmatpush.bf16.msra.mxu2 %v277_v18 }
  0x18   :  { %290 = vmatmul.msk.bf16.vlgmr.msra.gmra.mxu0 %vm92_vm0, %v295_v12 }
  0x19   :  { %292 = vmatmul.msk.bf16.vlgmr.msra.gmra.mxu2 %vm92_vm0, %v295_v12 }
  0x93   :  { %v119_v19 = vpop.f32.mrf.mxu1 }
  0x94   :  { %v140_v20 = vpack.c.bf16 %v119_v19, %v119_v19 }
  0x95   :  { %v105_v21 = vpop.f32.mrf.mxu0 }
  0x96   :  { %157 = vmatpush.bf16.xpose.msra.mxu3 %v140_v20  ;;  %v138_v22 = vpack.c.bf16 %v105_v21, %v105_v21 }
  0x9b   :  { %v121_v23 = vpop.f32.mrf.mxu1 }
  0x9c   :  { %v141_v24 = vpack.c.bf16 %v121_v23, %v121_v23  ;;  %v133_v40 = vpop.f32.mrf.mxu2 }
  0x9d   :  { %158 = vmatmul.bf16.vlgmr.msra.gmra.mxu3 %v138_v22  ;;  %v107_v25 = vpop.f32.mrf.mxu0  ;;  %v142_v42 = vpack.c.bf16 %v133_v40, %v133_v40 }
  0x9e   :  { %203 = vmatpush.bf16.xpose.msrb.mxu1 %v141_v24  ;;  %v139_v26 = vpack.c.bf16 %v107_v25, %v107_v25 }
  0x9f   :  { %v180_v44 = vsel %vm178_vm3, %v142_v42, 0 }
  0xa0   :  { %189 = vmatpush.bf16.msrb.mxu0 %v180_v44 }
  0xa4   :  { %v135_v41 = vpop.f32.mrf.mxu2 }
  0xa5   :  { %204 = vmatmul.bf16.vlgmr.msrb.gmra.mxu1 %v139_v26  ;;  %v143_v43 = vpack.c.bf16 %v135_v41, %v135_v41 }
  0xa7   :  { %v224_v45 = vsel %vm178_vm3, %v143_v43, 0 }
  0xa8   :  { %233 = vmatpush.bf16.msrb.mxu2 %v224_v45 }
 0x120   :  { %v159_v30 = vpop.f32.mrf.mxu3 }
 0x121   :  { %v160_v37 = vadd.f32 %v159_v30, %v149_v32 }
 0x122   :  { %v205_v33 = vpop.f32.mrf.mxu1 }
 0x123   :  { %v206_v34 = vadd.f32 %v205_v33, %v149_v32  ;;  %v164_v39 = vsel %vm163_vm2, %v160_v37, -inf }
 0x125   :  { %v209_v35 = vsel %vm163_vm2, %v206_v34, -inf }
 0x126   :  { %210 = vmax.xlane.f32.xlu0 %v209_v35 }
 0x128   :  { %v161_v36 = vpop.f32.mrf.mxu3 }
 0x12a   :  { %v207_v38 = vpop.f32.mrf.mxu1 }
 0x12e   :  { %165 = vmax.xlane.f32.xlu0 %v164_v39 }
 0x199   :  { %v211_v46 = vpop.xlane.xlu0 %210 }
 0x19a   :  { %v212_v47 = vsub.f32 %v206_v34, %v211_v46 }
 0x19c   :  { %v213_v48 = vmul.f32 1.442695, %v212_v47 }
 0x19e   :  { %312 = vpow2.f32 %v213_v48 }
 0x1a1   :  { %v166_v49 = vpop.xlane.xlu0 %165 }
 0x1a2   :  { %v167_v50 = vsub.f32 %v160_v37, %v166_v49 }
 0x1a4   :  { %v313_v51 = vpop.eup %312  ;;  %v168_v52 = vmul.f32 1.442695, %v167_v50 }
 0x1a5   :  { %v219_v53 = vpack.c.bf16 %v313_v51, %v313_v51  ;;  %v215_v57 = vsel %vm163_vm2, %v313_v51, 0.0 }
 0x1a6   :  { %314 = vpow2.f32 %v168_v52 }
 0x1a7   :  { %294 = vmatmul.msk.bf16.vlgmr.msrb.gmra.mxu2 %vm163_vm2, %v219_v53 }
 0x1ac   :  { %v315_v54 = vpop.eup %314 }
 0x1ad   :  { %v170_v55 = vsel %vm163_vm2, %v315_v54, 0.0  ;;  %v174_v56 = vpack.c.bf16 %v315_v54, %v315_v54 }
 0x1ae   :  { %171 = vadd.xlane.f32.xlu1 %v170_v55 }
 0x1af   :  { %293 = vmatmul.msk.bf16.vlgmr.msrb.gmra.mxu0 %vm163_vm2, %v174_v56 }
 0x1b6   :  { %216 = vadd.xlane.f32.xlu1 %v215_v57 }
 0x221   :  { %v172_v58 = vpop.xlane.xlu1 %171 }
 0x222   :  { %316 = vrcp.f32 %v172_v58 }
 0x228   :  { %v317_v61 = vpop.eup %316 }
 0x229   :  { %v217_v59 = vpop.xlane.xlu1 %216 }
 0x22a   :  { %318 = vrcp.f32 %v217_v59  ;;  %v235_v60 = vpop.f32.mrf.mxu2 }
 0x22c   :  { %v191_v62 = vpop.f32.mrf.mxu0 }
 0x22d   :  { %v195_v63 = vmul.f32 %v317_v61, %v191_v62 }
 0x22f   :  { %240 = vst [vmem:[#allocation7] sm:$0xff] %v195_v63 }
 0x230   :  { %v319_v0 = vpop.eup %318 }
 0x231   :  { %v239_v1 = vmul.f32 %v319_v0, %v235_v60 }
 0x232   :  { %v237_v2 = vpop.f32.mrf.mxu2 }
 0x233   :  { %241 = vst [vmem:[#allocation7 + $0x8] sm:$0xff] %v239_v1 }
 0x234   :  { %v193_v3 = vpop.f32.mrf.mxu0  ;;  %254 = dma.vmem_to_hbm [thread:$0]  %s247_s1, 256, %s249_s25, [#allocation4], %s406_s26, %s406_s26, %s407_s27  }
 0x235   :  { %396 = dma.done.wait [#allocation4], 256  }
 0x236   :  { %397 = vsyncadd [#allocation4], 4294967040 }
 0x237   :  { %259 = vsyncpa [#allocation3], 1 }
 0x238   :  { %260 = vsyncpa [#allocation6], 1 }
 0x239   :  { %261 = vsyncpa [#allocation4], 1 }

</bundles_post_ra>
